<compile_context>
chip_gen: v7x
topology: tpu7x:2x2x1
jax: 0.10.0
libtpu: 0.0.40
codegen_flags: <defaults>
</compile_context>

<pallas_src>
import jax
import jax.numpy as jnp
from jax.experimental import pallas as pl
from jax.experimental.pallas import tpu as pltpu


IN_FEATURES = 1
OUT_FEATURES = 10
BLOCK_ROWS = 1024  # batch rows per grid step (multiple of 8 sublanes)


def linear_kernel(w_ref, b_ref, x_ref, o_ref):
    # w_ref, b_ref: (1, OUT_FEATURES) f32 in VMEM (whole array, broadcast row)
    # x_ref:        (br, 1)            f32 in VMEM (batch block)
    # o_ref:        (br, OUT_FEATURES) f32 in VMEM (output block, final layout)
    # Single VPU broadcast FMA: (br,1) * (1,10) + (1,10) -> (br,10).
    o_ref[...] = x_ref[...] * w_ref[...] + b_ref[...]


def linear_forward(x, weight, bias, *, block_rows=BLOCK_ROWS):
    """y = x @ weight.T + bias   (PyTorch nn.Linear(1, 10) semantics).

    x:      (N, 1) f32
    weight: (10, 1) f32
    bias:   (10,)  f32
    returns (N, 10) f32
    """
    n = x.shape[0]
    assert x.shape[1] == IN_FEATURES

    x = x.astype(jnp.float32)
    # weight[o, 0] -> w_row[0, o]; bias[o] -> b_row[0, o]
    w_row = weight.reshape(1, OUT_FEATURES).astype(jnp.float32)
    b_row = bias.reshape(1, OUT_FEATURES).astype(jnp.float32)

    # Single block if the batch fits; otherwise tile in multiples of 8 rows and
    # let Pallas mask the ragged last block.
    br = min(block_rows, n)
    grid = pl.cdiv(n, br)

    cost = pl.CostEstimate(
        flops=2 * n * OUT_FEATURES,
        transcendentals=0,
        bytes_accessed=4 * (n * IN_FEATURES + n * OUT_FEATURES + 2 * OUT_FEATURES),
    )

    out = pl.pallas_call(
        linear_kernel,
        out_shape=jax.ShapeDtypeStruct((n, OUT_FEATURES), jnp.float32),
        grid_spec=pltpu.PrefetchScalarGridSpec(
            num_scalar_prefetch=0,
            grid=(grid,),
            in_specs=[
                pl.BlockSpec((1, OUT_FEATURES), lambda i: (0, 0)),    # weight row
                pl.BlockSpec((1, OUT_FEATURES), lambda i: (0, 0)),    # bias row
                pl.BlockSpec((br, IN_FEATURES), lambda i: (i, 0)),    # x block
            ],
            out_specs=pl.BlockSpec((br, OUT_FEATURES), lambda i: (i, 0)),
        ),
        compiler_params=pltpu.CompilerParams(
            dimension_semantics=("parallel",),
        ),
        cost_estimate=cost,
    )(w_row, b_row, x)

    return out


def init_params(key):
    # nn.Linear default init: U(-1/sqrt(fan_in), 1/sqrt(fan_in)), fan_in = 1.
    kw, kb = jax.random.split(key)
    bound = 1.0 / (IN_FEATURES ** 0.5)
    weight = jax.random.uniform(
        kw, (OUT_FEATURES, IN_FEATURES), jnp.float32, -bound, bound
    )
    bias = jax.random.uniform(kb, (OUT_FEATURES,), jnp.float32, -bound, bound)
    return weight, bias


if __name__ == "__main__":
    key = jax.random.PRNGKey(0)
    kx, kx2, kp = jax.random.split(key, 3)
    weight, bias = init_params(kp)

    # Small batch (single-block path).
    N = 16
    x = jax.random.normal(kx, (N, IN_FEATURES), dtype=jnp.float32)
    y = jax.block_until_ready(linear_forward(x, weight, bias))
    y_ref = x @ weight.T + bias
    assert y.shape == (N, OUT_FEATURES)
    assert jnp.allclose(y, y_ref, atol=1e-5, rtol=1e-5)

    # Multi-block + ragged-last-block path (grid > 1) with a tiny block size.
    N2 = 50
    x2 = jax.random.normal(kx2, (N2, IN_FEATURES), dtype=jnp.float32)
    y2 = jax.block_until_ready(linear_forward(x2, weight, bias, block_rows=16))
    y2_ref = x2 @ weight.T + bias
    assert y2.shape == (N2, OUT_FEATURES)
    assert jnp.allclose(y2, y2_ref, atol=1e-5, rtol=1e-5)

    print("KERNEL_OK")
</pallas_src>

<mosaic_0001>
module attributes {stable_mosaic.version = 11 : i64} {
  func.func @linear_kernel(%arg0: i32, %arg1: memref<1x10xf32, #tpu.memory_space<vmem>>, %arg2: memref<1x10xf32, #tpu.memory_space<vmem>>, %arg3: memref<16x1xf32, #tpu.memory_space<vmem>>, %arg4: memref<16x10xf32, #tpu.memory_space<vmem>>) attributes {dimension_semantics = [#tpu.dimension_semantics<parallel>], iteration_bounds = array<i64: 1>, scalar_prefetch = 0 : i64, scratch_operands = 0 : i64, tpu.core_type = #tpu.core_type<tc>, window_params = [{pipeline_mode = #tpu.pipeline_mode<synchronous>, transform_indices = @transform_0, window_bounds = array<i64: 1, 10>}, {pipeline_mode = #tpu.pipeline_mode<synchronous>, transform_indices = @transform_1, window_bounds = array<i64: 1, 10>}, {transform_indices = @transform_2, window_bounds = array<i64: 16, 1>}, {transform_indices = @transform_3, window_bounds = array<i64: 16, 10>}]} {
    %c0 = arith.constant 0 : index
    %c0_0 = arith.constant 0 : index
    %0 = vector.load %arg3[%c0, %c0_0] : memref<16x1xf32, #tpu.memory_space<vmem>>, vector<16x1xf32>
    %c0_1 = arith.constant 0 : index
    %c0_2 = arith.constant 0 : index
    %1 = vector.load %arg1[%c0_1, %c0_2] : memref<1x10xf32, #tpu.memory_space<vmem>>, vector<1x10xf32>
    %2 = vector.broadcast %0 : vector<16x1xf32> to vector<16x10xf32>
    %3 = vector.broadcast %1 : vector<1x10xf32> to vector<16x10xf32>
    %4 = arith.mulf %2, %3 : vector<16x10xf32>
    %c0_3 = arith.constant 0 : index
    %c0_4 = arith.constant 0 : index
    %5 = vector.load %arg2[%c0_3, %c0_4] : memref<1x10xf32, #tpu.memory_space<vmem>>, vector<1x10xf32>
    %6 = vector.broadcast %5 : vector<1x10xf32> to vector<16x10xf32>
    %7 = arith.addf %4, %6 : vector<16x10xf32>
    %c0_5 = arith.constant 0 : index
    %c0_6 = arith.constant 0 : index
    %8 = vector.load %arg4[%c0_5, %c0_6] : memref<16x10xf32, #tpu.memory_space<vmem>>, vector<16x10xf32>
    tpu.vector_store %arg4[%c0_5, %c0_6], %7 {strides = array<i32>} : memref<16x10xf32, #tpu.memory_space<vmem>>, vector<16x10xf32>,
    return
  }
  func.func @transform_0(%arg0: i32) -> (i32, i32) {
    %c0_i32 = arith.constant 0 : i32
    %c0_i32_0 = arith.constant 0 : i32
    %c0_i32_1 = arith.constant 0 : i32
    return %c0_i32, %c0_i32_0 : i32, i32
  }
  func.func @transform_1(%arg0: i32) -> (i32, i32) {
    %c0_i32 = arith.constant 0 : i32
    %c0_i32_0 = arith.constant 0 : i32
    %c0_i32_1 = arith.constant 0 : i32
    return %c0_i32, %c0_i32_0 : i32, i32
  }
  func.func @transform_2(%arg0: i32) -> (i32, i32) {
    %c0_i32 = arith.constant 0 : i32
    %c0_i32_0 = arith.constant 0 : i32
    return %arg0, %c0_i32 : i32, i32
  }
  func.func @transform_3(%arg0: i32) -> (i32, i32) {
    %c0_i32 = arith.constant 0 : i32
    %c0_i32_0 = arith.constant 0 : i32
    return %arg0, %c0_i32 : i32, i32
  }
}

</mosaic_0001>

<bundles_post_ra>
// kernel: tpu_custom_call.1
= control target key start
LH: loop header
LB: loop body
LE: loop exit
PB: predicated region body
PF: predicated region fallthrough
CT: control target
= control target key end

     0   :  { %v95_v1 = vmov 0   ;;  %s143_s0 = inlined_call_operand.vmem [shape: f32[1,10], index: 0, kind: input, shape index: {}]   ;;  %s144_s1 = inlined_call_operand.vmem [shape: f32[1,10], index: 1, kind: input, shape index: {}]   ;;  %s145_s2 = inlined_call_operand.vmem [shape: f32[16,1], index: 2, kind: input, shape index: {}]   ;;  %s146_s3 = inlined_call_operand.hbm [shape: f32[16,10], index: 3, kind: output, shape index: {}]  }
   0x1   :  { %v15_v0 = vld [vmem:[%s145_s2] sm:$0xff]  ;;  %70 = vset.pattern.permute.xlu0 %v95_v1 }
   0x2   :  { %8 = vsyncpa [#allocation3], 0  ;;  %20 = vperm.xlu0 %70, %v15_v0   ;;  %v16_v2 = vld [vmem:[%s145_s2 + $0x8] sm:$0xff]  ;;  %v64_v3 = vld [vmem:[%s143_s0] ss:$0 sm:$0xff]  ;;  %vm45_vm0 = vcmask 80896  }
   0x3   :  { %v65_v4 = vld [vmem:[%s144_s1] ss:$0 sm:$0xff]  ;;  %s96_s20 = smov [#allocation2]  }
   0x4   :  { %s53_s21 = sshll.u32 %s96_s20, 4  ;;  %s54_s21 = int_to_ptr.vmem [resolvable:$true] %s53_s21 }
   0x5   :  { %s71_s2 = scalar_lea.vmem %s54_s21, 256  ;;  %p76_p1 = scmp.lt.s32.totalorder %s54_s21, %s54_s21 }
   0x6   :  { %25 = vperm.xlu0 %70, %v16_v2   ;;  %p72_p0 = scmp.ne.s32.totalorder %s54_s21, %s71_s2  ;;  %p77_p2 = scmp.lt.s32.totalorder %s71_s2, %s71_s2 }
   0x8   :  { %p78_p3 = por %p77_p2, %p76_p1 }
   0xa   :  { %p79_p4 = pnand %p78_p3, %p72_p0 }
  0x81   :  { %v21_v5 = vpop.permute.xlu0 %20 }
  0x82   :  { %v34_v6 = vmul.f32 %v64_v3, %v21_v5 }
  0x84   :  { %v43_v7 = vadd.f32 %v65_v4, %v34_v6 }
  0x85   :  { %v26_v8 = vpop.permute.xlu0 %25 }
  0x86   :  { %46 = vst.msk [vmem:[#allocation2] sm:$0xff] %vm45_vm0, %v43_v7  ;;  %v35_v9 = vmul.f32 %v64_v3, %v26_v8 }
  0x88   :  { %v44_v10 = vadd.f32 %v65_v4, %v35_v9 }
  0x8a   :  { %47 = vst.msk [vmem:[#allocation2 + $0x8] sm:$0xff] %vm45_vm0, %v44_v10 }
  0x8b   :  { %82 = shalt.err (!%p79_p4)
}
  0x8c   :  { %s83_s22 = scalar_lea.hbm %s146_s3, 256 }
  0x8d   :  { %p84_p5 = scmp.ne.s32.totalorder %s146_s3, %s83_s22  ;;  %p87_p6 = scmp.lt.u32.totalorder %s83_s22, %s146_s3 }
  0x8f   :  { %p89_p7 = pnand %p87_p6, %p84_p5 }
  0x91   :  { %92 = shalt.err (!%p89_p7)
}
  0x92   :  { %s97_s27 = smov 128   ;;  %s98_s28 = smov 8  }
  0x93   :  { %59 = dma.vmem_to_hbm [thread:$0]  %s54_s21, 256, %s146_s3, [#allocation3], %s97_s27, %s97_s27, %s98_s28  }
  0x94   :  { %93 = dma.done.wait [#allocation3], 256  }
  0x95   :  { %94 = vsyncadd [#allocation3], 4294967040 }
  0x96   :  { %63 = vsyncpa [#allocation3], 1 }

</bundles_post_ra>
